<compile_context>
chip_gen: v6e
topology: v6e:2x2x1
jax: 0.10.0
libtpu: 0.0.40
codegen_flags: <defaults>
</compile_context>

<pallas_src>
import functools

import jax
import jax.numpy as jnp
from jax.experimental import pallas as pl
from jax.experimental.pallas import tpu as pltpu


def _round_up(x, m):
    return ((x + m - 1) // m) * m


def _mlp_kernel(s_ref, a_ref, w1s_ref, w1a_ref, b1_ref, w2_ref, b2_ref,
                w3_ref, b3_ref, q_ref):
    cdt = w1s_ref.dtype

    # fc1 as split-K (state part + action part): bf16 MXU operands, f32 acc.
    # (astype is a no-op when the streamed slab is already bf16.)
    h1 = (jnp.dot(s_ref[...].astype(cdt), w1s_ref[...],
                  preferred_element_type=jnp.float32)
          + jnp.dot(a_ref[...].astype(cdt), w1a_ref[...],
                    preferred_element_type=jnp.float32)
          + b1_ref[...])
    h1 = jnp.maximum(h1, 0.0)

    # fc2: bf16 MXU, f32 acc; bias/ReLU on the VPU in f32.
    h2 = jnp.dot(h1.astype(w2_ref.dtype), w2_ref[...],
                 preferred_element_type=jnp.float32) + b2_ref[...]
    h2 = jnp.maximum(h2, 0.0)

    # fc3 (hidden -> 1), computed transposed: contract the hidden (lane) dim of
    # both operands (same contraction pattern as the flash-attn 'bqd,bkd->bqk'
    # einsum) so the result is naturally (1, tile_m) -- lane-dense store, no
    # sublane->lane relayout needed.  Kept in f32.
    q = jnp.einsum("oh,mh->om", w3_ref[...], h2,
                   preferred_element_type=jnp.float32) + b3_ref[...]
    q_ref[...] = q.astype(q_ref.dtype)


@functools.partial(jax.jit, static_argnames=("tile_m", "compute_dtype"))
def centralized_q_critic_forward(state, actions_onehot, params,
                                 tile_m=None,
                                 compute_dtype=jnp.bfloat16):
    """state: (bs, T, state_dim); actions_onehot: (bs, T, n_agents, n_actions).

    Returns q of shape (bs, T, 1), f32.  `actions_onehot` may be bf16 (one-hot
    values are exactly representable); `state` may be f32 or bf16.
    """
    bs, T, state_dim = state.shape
    _, _, n_agents, n_actions = actions_onehot.shape
    act_dim = n_agents * n_actions
    rows = bs * T

    # _build_inputs without materializing the concat: keep the two slabs
    # separate (row-major views) and split fc1's weight along K instead.
    s2d = state.reshape(rows, state_dim)
    a2d = actions_onehot.reshape(rows, act_dim)
    # TODO(synk): lowest-HBM variant would stream int action indices and build
    # the one-hot inside the kernel (iota-compare) instead of streaming a2d.

    w1, b1, w2, b2, w3, b3 = params
    hidden = w1.shape[1]

    w1s = w1[:state_dim].astype(compute_dtype)        # (state_dim, hidden)
    w1a = w1[state_dim:].astype(compute_dtype)        # (act_dim,   hidden)
    w2c = w2.astype(compute_dtype)                    # (hidden,    hidden)
    w3_row = w3.reshape(1, hidden).astype(jnp.float32)   # fc3 weight as a row
    b1 = b1.reshape(1, hidden).astype(jnp.float32)
    b2 = b2.reshape(1, hidden).astype(jnp.float32)
    b3 = b3.reshape(1, 1).astype(jnp.float32)

    # Row tile: big tiles amortize the ~0.35us/step grid overhead and make the
    # input DMAs long.  Per-step footprint at tile_m=4096 is only a few MiB
    # (double-buffered x tiles + f32 h1/h2 temporaries), well under the scoped
    # VMEM default on v5e/v6e/v7x.  Cap at ceil(rows/2) rounded to 256 so
    # grid_m >= 2 and both v7x TensorCores get work.
    if tile_m is None:
        if rows <= 512:
            tile_m = _round_up(rows, 8)                 # single small tile
        else:
            tile_m = min(4096, _round_up(pl.cdiv(rows, 2), 256))
    grid_m = pl.cdiv(rows, tile_m)

    q_tiles = pl.pallas_call(
        _mlp_kernel,
        out_shape=jax.ShapeDtypeStruct((grid_m, tile_m), jnp.float32),
        grid_spec=pltpu.PrefetchScalarGridSpec(
            num_scalar_prefetch=0,
            grid=(grid_m,),
            in_specs=[
                # Streamed row tiles.
                pl.BlockSpec((tile_m, state_dim), lambda i: (i, 0)),
                pl.BlockSpec((tile_m, act_dim), lambda i: (i, 0)),
                # Weights / biases: constant block index -> VMEM-resident
                # across grid steps (no re-DMA).
                pl.BlockSpec((state_dim, hidden), lambda i: (0, 0)),
                pl.BlockSpec((act_dim, hidden), lambda i: (0, 0)),
                pl.BlockSpec((1, hidden), lambda i: (0, 0)),
                pl.BlockSpec((hidden, hidden), lambda i: (0, 0)),
                pl.BlockSpec((1, hidden), lambda i: (0, 0)),
                pl.BlockSpec((1, hidden), lambda i: (0, 0)),
                pl.BlockSpec((1, 1), lambda i: (0, 0)),
            ],
            # Lane-dense output: one (1, tile_m) row per grid step.
            out_specs=pl.BlockSpec((1, tile_m), lambda i: (i, 0)),
        ),
        compiler_params=pltpu.CompilerParams(
            # Row tiles are independent -> shard across v7x's 2 TensorCores.
            dimension_semantics=("parallel",)),
    )(s2d, a2d, w1s, w1a, b1, w2c, b2, w3_row, b3)

    # Drop the padded tail (rows % tile_m) before restoring (bs, T, 1).
    q = q_tiles.reshape(grid_m * tile_m)[:rows]
    return q.reshape(bs, T, 1)


def init_params(key, input_shape, hidden=128):
    """Deterministic init matching nn.Linear default (uniform +-1/sqrt(fan_in))."""
    ks = jax.random.split(key, 6)

    def lin(kw, kb, fan_in, fan_out):
        bound = 1.0 / jnp.sqrt(fan_in)
        w = jax.random.uniform(kw, (fan_in, fan_out), jnp.float32, -bound, bound)
        b = jax.random.uniform(kb, (1, fan_out), jnp.float32, -bound, bound)
        return w, b

    w1, b1 = lin(ks[0], ks[1], input_shape, hidden)
    w2, b2 = lin(ks[2], ks[3], hidden, hidden)
    w3, b3 = lin(ks[4], ks[5], hidden, 1)
    return (w1, b1, w2, b2, w3, b3)


def _ref_forward(state, actions_onehot, params, compute_dtype=jnp.bfloat16):
    """Pure-JAX reference emulating the kernel's bf16-operand / f32-acc math."""
    bs, T, _ = state.shape
    act = actions_onehot.reshape(bs, T, -1).astype(jnp.float32)
    inputs = jnp.concatenate([state.astype(jnp.float32), act], axis=-1)
    w1, b1, w2, b2, w3, b3 = params

    def rt(x):  # round-trip through the compute dtype
        return x.astype(compute_dtype).astype(jnp.float32)

    h = jnp.maximum(jnp.dot(rt(inputs), rt(w1)) + b1, 0.0)
    h = jnp.maximum(jnp.dot(rt(h), rt(w2)) + b2, 0.0)
    q = jnp.sum(h * w3[:, 0], axis=-1, keepdims=True) + b3.reshape(1, 1)
    return q


if __name__ == "__main__":
    # Small synthetic config consistent with the module.
    bs, T = 2, 8
    state_dim, n_agents, n_actions = 48, 4, 4
    input_shape = state_dim + n_agents * n_actions  # 64

    key = jax.random.PRNGKey(0)
    k_state, k_act, k_param = jax.random.split(key, 3)

    state = jax.random.normal(k_state, (bs, T, state_dim), jnp.float32)
    act_idx = jax.random.randint(k_act, (bs, T, n_agents), 0, n_actions)
    # bf16 one-hots: exact values, half the HBM bytes of the action slab.
    actions_onehot = jax.nn.one_hot(act_idx, n_actions, dtype=jnp.bfloat16)

    params = init_params(k_param, input_shape)
    q_ref = _ref_forward(state, actions_onehot, params)

    # Default tile (single tile at this tiny size).
    q = jax.block_until_ready(
        centralized_q_critic_forward(state, actions_onehot, params))
    assert q.shape == (bs, T, 1)
    assert jnp.allclose(q, q_ref, atol=2e-3, rtol=2e-3), (
        float(jnp.max(jnp.abs(q - q_ref))))

    # tile_m=8 forces a multi-step grid even at this tiny size, exercising the
    # row pipeline, VMEM-resident weights, and the lane-dense per-step store.
    q2 = jax.block_until_ready(
        centralized_q_critic_forward(state, actions_onehot, params, tile_m=8))
    assert jnp.allclose(q2, q_ref, atol=2e-3, rtol=2e-3), (
        float(jnp.max(jnp.abs(q2 - q_ref))))

    print("KERNEL_OK")
</pallas_src>

<mosaic_0001>
module attributes {stable_mosaic.version = 11 : i64} {
  func.func @_mlp_kernel(%arg0: i32, %arg1: memref<16x48xf32, #tpu.memory_space<vmem>>, %arg2: memref<16x16xbf16, #tpu.memory_space<vmem>>, %arg3: memref<48x128xbf16, #tpu.memory_space<vmem>>, %arg4: memref<16x128xbf16, #tpu.memory_space<vmem>>, %arg5: memref<1x128xf32, #tpu.memory_space<vmem>>, %arg6: memref<128x128xbf16, #tpu.memory_space<vmem>>, %arg7: memref<1x128xf32, #tpu.memory_space<vmem>>, %arg8: memref<1x128xf32, #tpu.memory_space<vmem>>, %arg9: memref<1x1xf32, #tpu.memory_space<vmem>>, %arg10: memref<1x16xf32, #tpu.memory_space<vmem>>) attributes {dimension_semantics = [#tpu.dimension_semantics<parallel>], iteration_bounds = array<i64: 1>, scalar_prefetch = 0 : i64, scratch_operands = 0 : i64, tpu.core_type = #tpu.core_type<tc>, window_params = [{transform_indices = @transform_0, window_bounds = array<i64: 16, 48>}, {transform_indices = @transform_1, window_bounds = array<i64: 16, 16>}, {pipeline_mode = #tpu.pipeline_mode<synchronous>, transform_indices = @transform_2, window_bounds = array<i64: 48, 128>}, {pipeline_mode = #tpu.pipeline_mode<synchronous>, transform_indices = @transform_3, window_bounds = array<i64: 16, 128>}, {pipeline_mode = #tpu.pipeline_mode<synchronous>, transform_indices = @transform_4, window_bounds = array<i64: 1, 128>}, {pipeline_mode = #tpu.pipeline_mode<synchronous>, transform_indices = @transform_5, window_bounds = array<i64: 128, 128>}, {pipeline_mode = #tpu.pipeline_mode<synchronous>, transform_indices = @transform_6, window_bounds = array<i64: 1, 128>}, {pipeline_mode = #tpu.pipeline_mode<synchronous>, transform_indices = @transform_7, window_bounds = array<i64: 1, 128>}, {pipeline_mode = #tpu.pipeline_mode<synchronous>, transform_indices = @transform_8, window_bounds = array<i64: 1, 1>}, {transform_indices = @transform_9, window_bounds = array<i64: 1, 16>}]} {
    %c0 = arith.constant 0 : index
    %c0_0 = arith.constant 0 : index
    %0 = vector.load %arg1[%c0, %c0_0] : memref<16x48xf32, #tpu.memory_space<vmem>>, vector<16x48xf32>
    %1 = arith.truncf %0 : vector<16x48xf32> to vector<16x48xbf16>
    %c0_1 = arith.constant 0 : index
    %c0_2 = arith.constant 0 : index
    %2 = vector.load %arg3[%c0_1, %c0_2] : memref<48x128xbf16, #tpu.memory_space<vmem>>, vector<48x128xbf16>
    %cst = arith.constant dense<0.000000e+00> : vector<16x128xf32>
    %3 = tpu.matmul %1, %2, %cst {dimension_numbers = #tpu.dot_dimension_numbers<[1], [0], [0], [1], [0, 0, 1, 1], [], []>} : vector<16x48xbf16>, vector<48x128xbf16>, vector<16x128xf32> -> vector<16x128xf32>
    %c0_3 = arith.constant 0 : index
    %c0_4 = arith.constant 0 : index
    %4 = vector.load %arg2[%c0_3, %c0_4] : memref<16x16xbf16, #tpu.memory_space<vmem>>, vector<16x16xbf16>
    %c0_5 = arith.constant 0 : index
    %c0_6 = arith.constant 0 : index
    %5 = vector.load %arg4[%c0_5, %c0_6] : memref<16x128xbf16, #tpu.memory_space<vmem>>, vector<16x128xbf16>
    %cst_7 = arith.constant dense<0.000000e+00> : vector<16x128xf32>
    %6 = tpu.matmul %4, %5, %cst_7 {dimension_numbers = #tpu.dot_dimension_numbers<[1], [0], [0], [1], [0, 0, 1, 1], [], []>} : vector<16x16xbf16>, vector<16x128xbf16>, vector<16x128xf32> -> vector<16x128xf32>
    %7 = arith.addf %3, %6 : vector<16x128xf32>
    %c0_8 = arith.constant 0 : index
    %c0_9 = arith.constant 0 : index
    %8 = vector.load %arg5[%c0_8, %c0_9] : memref<1x128xf32, #tpu.memory_space<vmem>>, vector<1x128xf32>
    %9 = vector.broadcast %8 : vector<1x128xf32> to vector<16x128xf32>
    %10 = arith.addf %7, %9 : vector<16x128xf32>
    %cst_10 = arith.constant 0.000000e+00 : f32
    %11 = vector.broadcast %cst_10 : f32 to vector<16x128xf32>
    %12 = arith.maximumf %10, %11 : vector<16x128xf32>
    %13 = arith.truncf %12 : vector<16x128xf32> to vector<16x128xbf16>
    %c0_11 = arith.constant 0 : index
    %c0_12 = arith.constant 0 : index
    %14 = vector.load %arg6[%c0_11, %c0_12] : memref<128x128xbf16, #tpu.memory_space<vmem>>, vector<128x128xbf16>
    %cst_13 = arith.constant dense<0.000000e+00> : vector<16x128xf32>
    %15 = tpu.matmul %13, %14, %cst_13 {dimension_numbers = #tpu.dot_dimension_numbers<[1], [0], [0], [1], [0, 0, 1, 1], [], []>} : vector<16x128xbf16>, vector<128x128xbf16>, vector<16x128xf32> -> vector<16x128xf32>
    %c0_14 = arith.constant 0 : index
    %c0_15 = arith.constant 0 : index
    %16 = vector.load %arg7[%c0_14, %c0_15] : memref<1x128xf32, #tpu.memory_space<vmem>>, vector<1x128xf32>
    %17 = vector.broadcast %16 : vector<1x128xf32> to vector<16x128xf32>
    %18 = arith.addf %15, %17 : vector<16x128xf32>
    %cst_16 = arith.constant 0.000000e+00 : f32
    %19 = vector.broadcast %cst_16 : f32 to vector<16x128xf32>
    %20 = arith.maximumf %18, %19 : vector<16x128xf32>
    %c0_17 = arith.constant 0 : index
    %c0_18 = arith.constant 0 : index
    %21 = vector.load %arg8[%c0_17, %c0_18] : memref<1x128xf32, #tpu.memory_space<vmem>>, vector<1x128xf32>
    "tpu.trace_start"() <{level = 10 : i32, message = "oh,mh->om"}> : () -> ()
    %cst_19 = arith.constant dense<0.000000e+00> : vector<1x16xf32>
    %22 = tpu.matmul %21, %20, %cst_19 {dimension_numbers = #tpu.dot_dimension_numbers<[1], [1], [0], [0], [0, 0, 1, 0], [], []>} : vector<1x128xf32>, vector<16x128xf32>, vector<1x16xf32> -> vector<1x16xf32>
    "tpu.trace_stop"() : () -> ()
    %c0_20 = arith.constant 0 : index
    %c0_21 = arith.constant 0 : index
    %23 = vector.load %arg9[%c0_20, %c0_21] : memref<1x1xf32, #tpu.memory_space<vmem>>, vector<1x1xf32>
    %24 = vector.broadcast %23 : vector<1x1xf32> to vector<1x16xf32>
    %25 = arith.addf %22, %24 : vector<1x16xf32>
    %c0_22 = arith.constant 0 : index
    %c0_23 = arith.constant 0 : index
    %26 = vector.load %arg10[%c0_22, %c0_23] : memref<1x16xf32, #tpu.memory_space<vmem>>, vector<1x16xf32>
    tpu.vector_store %arg10[%c0_22, %c0_23], %25 {strides = array<i32>} : memref<1x16xf32, #tpu.memory_space<vmem>>, vector<1x16xf32>,
    return
  }
  func.func @transform_0(%arg0: i32) -> (i32, i32) {
    %c0_i32 = arith.constant 0 : i32
    %c0_i32_0 = arith.constant 0 : i32
    return %arg0, %c0_i32 : i32, i32
  }
  func.func @transform_1(%arg0: i32) -> (i32, i32) {
    %c0_i32 = arith.constant 0 : i32
    %c0_i32_0 = arith.constant 0 : i32
    return %arg0, %c0_i32 : i32, i32
  }
  func.func @transform_2(%arg0: i32) -> (i32, i32) {
    %c0_i32 = arith.constant 0 : i32
    %c0_i32_0 = arith.constant 0 : i32
    %c0_i32_1 = arith.constant 0 : i32
    return %c0_i32, %c0_i32_0 : i32, i32
  }
  func.func @transform_3(%arg0: i32) -> (i32, i32) {
    %c0_i32 = arith.constant 0 : i32
    %c0_i32_0 = arith.constant 0 : i32
    %c0_i32_1 = arith.constant 0 : i32
    return %c0_i32, %c0_i32_0 : i32, i32
  }
  func.func @transform_4(%arg0: i32) -> (i32, i32) {
    %c0_i32 = arith.constant 0 : i32
    %c0_i32_0 = arith.constant 0 : i32
    %c0_i32_1 = arith.constant 0 : i32
    return %c0_i32, %c0_i32_0 : i32, i32
  }
  func.func @transform_5(%arg0: i32) -> (i32, i32) {
    %c0_i32 = arith.constant 0 : i32
    %c0_i32_0 = arith.constant 0 : i32
    %c0_i32_1 = arith.constant 0 : i32
    return %c0_i32, %c0_i32_0 : i32, i32
  }
  func.func @transform_6(%arg0: i32) -> (i32, i32) {
    %c0_i32 = arith.constant 0 : i32
    %c0_i32_0 = arith.constant 0 : i32
    %c0_i32_1 = arith.constant 0 : i32
    return %c0_i32, %c0_i32_0 : i32, i32
  }
  func.func @transform_7(%arg0: i32) -> (i32, i32) {
    %c0_i32 = arith.constant 0 : i32
    %c0_i32_0 = arith.constant 0 : i32
    %c0_i32_1 = arith.constant 0 : i32
    return %c0_i32, %c0_i32_0 : i32, i32
  }
  func.func @transform_8(%arg0: i32) -> (i32, i32) {
    %c0_i32 = arith.constant 0 : i32
    %c0_i32_0 = arith.constant 0 : i32
    %c0_i32_1 = arith.constant 0 : i32
    return %c0_i32, %c0_i32_0 : i32, i32
  }
  func.func @transform_9(%arg0: i32) -> (i32, i32) {
    %c0_i32 = arith.constant 0 : i32
    %c0_i32_0 = arith.constant 0 : i32
    return %arg0, %c0_i32 : i32, i32
  }
}

</mosaic_0001>

<bundles_post_ra>
// kernel: centralized_q_critic_forward.1
= control target key start
LH: loop header
LB: loop body
LE: loop exit
PB: predicated region body
PF: predicated region fallthrough
CT: control target
= control target key end

     0   :  { %v475_v0 = vmov 0.0   ;;  %vm476_vm0 = vmmov 0   ;;  %vm59_vm1 = vcmask 130048   ;;  %vm122_vm2 = vcmask 392192   ;;  %s610_s3 = inlined_call_operand.vmem [shape: bf16[16,128], index: 3, kind: input, shape index: {}]   ;;  %s611_s1 = inlined_call_operand.vmem [shape: bf16[16,16], index: 1, kind: input, shape index: {}]   ;;  %s612_s2 = inlined_call_operand.vmem [shape: bf16[48,128], index: 2, kind: input, shape index: {}]   ;;  %s613_s5 = inlined_call_operand.vmem [shape: bf16[128,128], index: 5, kind: input, shape index: {}]   ;;  %s614_s0 = inlined_call_operand.vmem [shape: f32[16,48], index: 0, kind: input, shape index: {}]   ;;  %s615_s4 = inlined_call_operand.vmem [shape: f32[1,128], index: 4, kind: input, shape index: {}]   ;;  %s616_s8 = inlined_call_operand.<no memory space> [shape: f32[1,1], index: 8, kind: input, shape index: {}]   ;;  %s617_s6 = inlined_call_operand.vmem [shape: f32[1,128], index: 6, kind: input, shape index: {}]   ;;  %s618_s7 = inlined_call_operand.vmem [shape: f32[1,128], index: 7, kind: input, shape index: {}]   ;;  %s619_s9 = inlined_call_operand.vmem [shape: f32[1,16], index: 9, kind: output, shape index: {}]  }
   0x1   :  { %415 = vmatprep.subr.bf16.mxu1 %v475_v0  ;;  %v462_v1 = vld [vmem:[%s610_s3] sm:$0xff]   ;;  %417 = vmatprep.mubr.msk.bf16.mxu1 %vm476_vm0, %v475_v0  ;;  %v464_v3 = vld [vmem:[%s612_s2 + $0x10] sm:$0xff]   ;;  %v465_v4 = vld [vmem:[%s612_s2 + $0x8] sm:$0xff]   ;;  %v477_v33 = vmov 0   ;;  %v14_v34 = vstv %s616_s8  ;;  %v300_v46 = vlaneseq  ;;  %vm374_vm3 = vcmask 122880  }
   0x2   :  { %v463_v2 = vld [vmem:[%s611_s1] sm:$0xff]   ;;  %431 = vmatprep.subr.bf16.mxu0 %v475_v0  ;;  %447 = vmatprep.mubr.msk.bf16.mxu0 %vm476_vm0, %v475_v0  ;;  %v467_v5 = vld [vmem:[%s613_s5 + $0x38] sm:$0xff]   ;;  %v468_v6 = vld [vmem:[%s613_s5 + $0x30] sm:$0xff]   ;;  %15 = vst [vmem:[#allocation2] sm:$0x1] %v14_v34 }
   0x3   :  { %416 = vmatpush3.bf16.msra.mxu1 %v462_v1  ;;  %v466_v7 = vld [vmem:[%s612_s2] sm:$0xff]   ;;  %v36_v9 = vld [vmem:[%s614_s0 + $0x8] sm:$0xff]  ;;  %432 = vmatpush3.bf16.msra.mxu0 %v467_v5  ;;  %v471_v13 = vld [vmem:[%s613_s5 + $0x18] sm:$0xff]   ;;  %v301_v47 = vshrl.u32 %v300_v46, 7 }
   0x4   :  { %421 = vmatprep.subr.bf16.mxu1 %v475_v0  ;;  %v35_v8 = vld [vmem:[%s614_s0] sm:$0xff]  ;;  %433 = vmatprep.subr.bf16.mxu0 %v475_v0  ;;  %v469_v11 = vld [vmem:[%s613_s5 + $0x28] sm:$0xff]   ;;  %v472_v14 = vld [vmem:[%s613_s5 + $0x10] sm:$0xff]  }
   0x5   :  { %v37_v10 = vpack.c.bf16 %v36_v9, %v35_v8  ;;  %v470_v12 = vld [vmem:[%s613_s5 + $0x20] sm:$0xff]   ;;  %v473_v15 = vld [vmem:[%s613_s5 + $0x8] sm:$0xff]   ;;  %461 = vset.pattern.permute.xlu0 %v477_v33  ;;  %v302_v48 = vsub.s32 0, %v301_v47 }
   0x6   :  { %418 = vmatmul.mubr.msk.bf16.vlgmr.msra.gmra.mxu1 %vm59_vm1, %v463_v2  ;;  %v474_v16 = vld [vmem:[%s613_s5] sm:$0xff]  }
   0x7   :  { %422 = vmatpush3.bf16.msra.mxu1 %v464_v3  ;;  %427 = vmatprep.mubr.msk.bf16.mxu1 %vm476_vm0, %v475_v0  ;;  %v387_v23 = vld [vmem:[%s615_s4] ss:$0 sm:$0xff] }
   0x8   :  { %423 = vmatprep.subr.bf16.mxu1 %v475_v0  ;;  %434 = vmatpush3.bf16.msra.mxu0 %v468_v6  ;;  %v388_v38 = vld [vmem:[%s617_s6] ss:$0 sm:$0xff] }
   0x9   :  { %435 = vmatprep.subr.bf16.mxu0 %v475_v0  ;;  %v294_v35 = vld [vmem:[#allocation2] sm:$0x1] }
   0xa   :  { %297 = vperm.xlu0 %461, %v294_v35   ;;  %v293_v45 = vld [vmem:[%s618_s7] sm:$0x1] }
   0xb   :  { %424 = vmatpush3.bf16.msra.mxu1 %v465_v4 }
   0xc   :  { %425 = vmatprep.subr.bf16.mxu1 %v475_v0  ;;  %436 = vmatpush3.bf16.msra.mxu0 %v469_v11 }
   0xd   :  { %437 = vmatprep.subr.bf16.mxu0 %v475_v0 }
   0xf   :  { %426 = vmatpush3.bf16.msra.mxu1 %v466_v7 }
  0x10   :  { %451 = vmatprep.subr.mxu1 %v475_v0  ;;  %438 = vmatpush3.bf16.msra.mxu0 %v470_v12 }
  0x11   :  { %439 = vmatprep.subr.bf16.mxu0 %v475_v0 }
  0x12   :  { %428 = vmatmul.mubr.msk.bf16.vlgmr.msra.gmra.mxu1 %vm122_vm2, %v37_v10 }
  0x13   :  { %455 = vmatprep.mubr.msk.f32.mxu1 %vm476_vm0, %v475_v0 }
  0x14   :  { %440 = vmatpush3.bf16.msra.mxu0 %v471_v13 }
  0x15   :  { %441 = vmatprep.subr.bf16.mxu0 %v475_v0 }
  0x18   :  { %442 = vmatpush3.bf16.msra.mxu0 %v472_v14 }
  0x19   :  { %443 = vmatprep.subr.bf16.mxu0 %v475_v0 }
  0x1c   :  { %444 = vmatpush3.bf16.msra.mxu0 %v473_v15 }
  0x1d   :  { %445 = vmatprep.subr.bf16.mxu0 %v475_v0 }
  0x20   :  { %446 = vmatpush3.bf16.msra.mxu0 %v474_v16 }
  0x85   :  { %v298_v49 = vpop.permute.xlu0 %297 }
  0x86   :  { %v303_v50 = vrot.slane %v298_v49, %v302_v48 }
  0xc6   :  { %v97_v17 = vpop.f32.mrf.mxu1 }
  0xc8   :  { %v419_v18 = vpop.f32.mrf.mxu1 }
  0xca   :  { %v100_v19 = vpop.f32.mrf.mxu1 }
  0xcc   :  { %v420_v20 = vpop.f32.mrf.mxu1 }
  0xd2   :  { %v160_v21 = vpop.f32.mrf.mxu1 }
  0xd3   :  { %v161_v22 = vadd.f32 %v160_v21, %v97_v17 }
  0xd4   :  { %v429_v24 = vpop.f32.mrf.mxu1 }
  0xd5   :  { %v174_v26 = vadd.f32 %v387_v23, %v161_v22 }
  0xd6   :  { %v163_v25 = vpop.f32.mrf.mxu1 }
  0xd7   :  { %v164_v27 = vadd.f32 %v163_v25, %v100_v19  ;;  %v176_v30 = vmax.f32 %v174_v26, 0.0 }
  0xd8   :  { %v430_v28 = vpop.f32.mrf.mxu1 }
  0xd9   :  { %v175_v29 = vadd.f32 %v387_v23, %v164_v27 }
  0xdb   :  { %v177_v31 = vmax.f32 %v175_v29, 0.0 }
  0xdd   :  { %v178_v32 = vpack.c.bf16 %v177_v31, %v176_v30 }
  0xdf   :  { %448 = vmatmul.mubr.bf16.vlgmr.msra.gmra.mxu0 %v178_v32 }
 0x19f   :  { %v284_v36 = vpop.f32.mrf.mxu0 }
 0x1a0   :  { %v285_v42 = vadd.f32 %v388_v38, %v284_v36 }
 0x1a1   :  { %v449_v37 = vpop.f32.mrf.mxu0 }
 0x1a2   :  { %v291_v44 = vmax.f32 %v285_v42, 0.0 }
 0x1a3   :  { %v287_v39 = vpop.f32.mrf.mxu0 }
 0x1a4   :  { %v288_v40 = vadd.f32 %v388_v38, %v287_v39 }
 0x1a5   :  { %v450_v41 = vpop.f32.mrf.mxu0 }
 0x1a6   :  { %v292_v43 = vmax.f32 %v288_v40, 0.0 }
 0x1a8   :  { %452 = vmatpush3.xpose.msra.mxu1 %v292_v43 }
 0x1a9   :  { %453 = vmatprep.subr.mxu1 %v475_v0 }
 0x1ac   :  { %454 = vmatpush3.xpose.msra.mxu1 %v291_v44 }
 0x1af   :  { %456 = vmatmul.mubr.f32.vlgmr.msra.gmra.mxu1 %v293_v45 }
 0x26f   :  { %v370_v51 = vpop.f32.mrf.mxu1 }
 0x270   :  { %v371_v52 = vadd.f32 %v370_v51, %v303_v50 }
 0x271   :  { %v457_v53 = vpop.f32.mrf.mxu1 }
 0x272   :  { %375 = vst.msk [vmem:[%s619_s9] sm:$0x1] %vm374_vm3, %v371_v52 }

</bundles_post_ra>
